<compile_context>
chip_gen: v7x
topology: tpu7x:2x2x1
jax: 0.10.0
libtpu: 0.0.40
codegen_flags: <defaults>
</compile_context>

<pallas_src>
import jax
import jax.numpy as jnp
from jax import lax
from jax.experimental import pallas as pl
from jax.experimental.pallas import tpu as pltpu


def _thought_kernel_split(ctx_ref, sum_ref, wc_ref, ws_ref, b_ref, o_ref):
    """No-concat path: o = ctx @ Wc.T + sum @ Ws.T + b (single full-K pass)."""
    dn = (((1,), (1,)), ((), ()))      # contract the last axis of both operands
    acc = lax.dot_general(ctx_ref[...], wc_ref[...], dn,
                          preferred_element_type=jnp.float32)
    acc = acc + lax.dot_general(sum_ref[...], ws_ref[...], dn,
                                preferred_element_type=jnp.float32)
    o_ref[...] = (acc + b_ref[...]).astype(o_ref.dtype)


def _thought_kernel_concat(x_ref, w_ref, b_ref, o_ref):
    """Fallback path (dim not lane-aligned): o = x @ W.T + b, x pre-concatenated."""
    acc = lax.dot_general(x_ref[...], w_ref[...], (((1,), (1,)), ((), ())),
                          preferred_element_type=jnp.float32)
    o_ref[...] = (acc + b_ref[...]).astype(o_ref.dtype)


def _fit_tile(extent, cap, quantum):
    """Tile size: full extent if it fits `cap`, else a multiple of `quantum`.

    Prefers exact divisors of `extent` (no masked edge blocks); otherwise
    returns the aligned cap and the caller uses a cdiv grid.
    """
    if extent <= cap:
        return extent
    cap = max((cap // quantum) * quantum, quantum)
    t = cap
    while t >= quantum:
        if extent % t == 0:
            return t
        t -= quantum
    return cap


def thought_unit(summary_output, context_output, weight, bias, *, compute_dtype=None):
    """Pallas ThoughtUnit forward.

    summary_output : [B, dim]
    context_output : [B, dim]
    weight         : [dim, 2*dim]   (PyTorch nn.Linear convention, y = x @ W.T + b)
    bias           : [dim]
    compute_dtype  : optional MXU input dtype (e.g. jnp.bfloat16); accumulation
                     is always f32, output keeps the input dtype.
    returns        : [B, dim]
    """
    B, dim = context_output.shape
    assert summary_output.shape == (B, dim)
    assert weight.shape == (dim, 2 * dim)
    assert bias.shape == (dim,)
    two_dim = 2 * dim

    out_dtype = context_output.dtype
    cdt = jnp.dtype(compute_dtype) if compute_dtype is not None else jnp.dtype(out_dtype)

    ctx = context_output.astype(cdt)
    summ = summary_output.astype(cdt)
    w = weight.astype(cdt)
    bias2d = bias.reshape(1, dim).astype(jnp.float32)   # tiny; keep bias add in f32

    act_item = cdt.itemsize
    out_item = jnp.dtype(out_dtype).itemsize
    b_quant = 16 if act_item < 4 else 8                 # sublane quantum (bf16 packs x2)

    # --- per-generation VMEM budget (v5e/v6e: 128 MiB phys, v7x: 64 MiB) -----
    try:
        phys_vmem = pltpu.get_tpu_info().vmem_capacity_bytes
    except Exception:
        phys_vmem = 64 << 20                             # v7x worst case
    vmem_limit = min(phys_vmem // 2, 64 << 20)           # 64 MiB v5e/v6e, 32 MiB v7x
    tile_budget = (vmem_limit * 3) // 4                  # headroom for pipeline internals

    # --- tile selection --------------------------------------------------------
    # The double-buffered weight block (TN rows of full-K) dominates: give it
    # ~2/3 of the budget, the rest goes to activation / output rows.
    w_row_bytes = two_dim * act_item * 2                 # per weight row, x2 buffers
    tn_cap = max((2 * tile_budget) // (3 * w_row_bytes), 128)
    TN = _fit_tile(dim, tn_cap, 128)                     # output-column tile (lane-dense)

    row_bytes = (two_dim * act_item * 2                  # ctx+sum (or x) blocks, x2 buffers
                 + TN * (out_item * 2 + 4))              # output block + f32 regs
    tb_cap = max((tile_budget - TN * w_row_bytes) // row_bytes, b_quant)
    TB = _fit_tile(B, min(tb_cap, 1024), b_quant)        # batch tile

    nb, nn = pl.cdiv(B, TB), pl.cdiv(dim, TN)

    # Keep >= 2 parallel blocks so both v7x TensorCores get work.
    if nb * nn < 2:
        if dim % 256 == 0:
            TN, nn = dim // 2, 2
        elif B % (2 * b_quant) == 0:
            TB, nb = B // 2, 2

    # Note: for extremely large dim where even a (128, 2*dim) weight block would
    # overflow VMEM, a K-tiled accumulator variant would be required; not needed
    # for MAC-sized hidden dimensions.

    cost = pl.CostEstimate(
        flops=2 * B * two_dim * dim,
        transcendentals=0,
        bytes_accessed=(nb * dim * two_dim * act_item      # weight, re-read per batch tile
                        + nn * B * two_dim * act_item      # activations, re-read per N tile
                        + B * dim * out_item               # output
                        + dim * 4),                        # bias
    )
    cparams = pltpu.CompilerParams(
        dimension_semantics=("parallel", "parallel"),
        vmem_limit_bytes=vmem_limit,
    )
    out_shape = jax.ShapeDtypeStruct((B, dim), out_dtype)
    out_spec = pl.BlockSpec((TB, TN), lambda b, n: (b, n))
    bias_spec = pl.BlockSpec((1, TN), lambda b, n: (0, n))

    if dim % 128 == 0:
        # No HBM concat: context / summary are separate operands; the weight is
        # passed twice and its two BlockSpecs select the [:, :dim] / [:, dim:]
        # halves (block-K index 0 / 1), so all blocks stay (8,128)-aligned.
        act_spec = pl.BlockSpec((TB, dim), lambda b, n: (b, 0))
        return pl.pallas_call(
            _thought_kernel_split,
            out_shape=out_shape,
            grid_spec=pltpu.PrefetchScalarGridSpec(
                num_scalar_prefetch=0,
                grid=(nb, nn),
                in_specs=[
                    act_spec,                                       # context
                    act_spec,                                       # summary
                    pl.BlockSpec((TN, dim), lambda b, n: (n, 0)),   # W[:, :dim]
                    pl.BlockSpec((TN, dim), lambda b, n: (n, 1)),   # W[:, dim:]
                    bias_spec,
                ],
                out_specs=out_spec,
            ),
            compiler_params=cparams,
            cost_estimate=cost,
        )(ctx, summ, w, w, bias2d)

    # Fallback for dims that are not a multiple of 128 (e.g. tiny test dims):
    # wrapper-side concat (O(B*2*dim), negligible here) + a single full-K dot.
    x = jnp.concatenate([ctx, summ], axis=1)             # [B, 2*dim], torch.cat order
    return pl.pallas_call(
        _thought_kernel_concat,
        out_shape=out_shape,
        grid_spec=pltpu.PrefetchScalarGridSpec(
            num_scalar_prefetch=0,
            grid=(nb, nn),
            in_specs=[
                pl.BlockSpec((TB, two_dim), lambda b, n: (b, 0)),   # [ctx | sum]
                pl.BlockSpec((TN, two_dim), lambda b, n: (n, 0)),   # weight (native layout)
                bias_spec,
            ],
            out_specs=out_spec,
        ),
        compiler_params=cparams,
        cost_estimate=cost,
    )(x, w, bias2d)


def _reference(summary_output, context_output, weight, bias):
    x = jnp.concatenate([context_output, summary_output], axis=1)
    return x @ weight.T + bias


def _make_inputs(key, B, dim):
    k1, k2, k3, k4 = jax.random.split(key, 4)
    summary = jax.random.normal(k1, (B, dim), dtype=jnp.float32)
    context = jax.random.normal(k2, (B, dim), dtype=jnp.float32)
    weight = jax.random.normal(k3, (dim, 2 * dim), dtype=jnp.float32) * 0.05
    bias = jax.random.normal(k4, (dim,), dtype=jnp.float32) * 0.05
    return summary, context, weight, bias


if __name__ == "__main__":
    key = jax.random.PRNGKey(0)
    k_a, k_b, k_c = jax.random.split(key, 3)

    # 1) Small shape consistent with the module (single full-extent block,
    #    concat fallback path, f32 end-to-end).
    summary, context, weight, bias = _make_inputs(k_a, B=2, dim=32)
    out = jax.block_until_ready(thought_unit(summary, context, weight, bias))
    ref = _reference(summary, context, weight, bias)
    assert out.shape == (2, 32)
    assert jnp.allclose(out, ref, atol=1e-5, rtol=1e-5), "mismatch (B=2, dim=32)"

    # 2) Lane-aligned dim: no-concat / split-weight path, f32, grid split in N
    #    so both v7x TensorCores get a tile.
    summary, context, weight, bias = _make_inputs(k_b, B=8, dim=256)
    out = jax.block_until_ready(thought_unit(summary, context, weight, bias))
    ref = _reference(summary, context, weight, bias)
    assert out.shape == (8, 256)
    assert jnp.allclose(out, ref, atol=2e-3, rtol=2e-3), "mismatch (B=8, dim=256)"

    # 3) bf16 compute path (the production configuration: halved weight stream,
    #    f32 accumulation), MAC-typical dim.
    summary, context, weight, bias = _make_inputs(k_c, B=16, dim=512)
    out = jax.block_until_ready(
        thought_unit(summary, context, weight, bias, compute_dtype=jnp.bfloat16))
    ref = _reference(summary, context, weight, bias)
    assert out.shape == (16, 512)
    assert jnp.allclose(out, ref, atol=3e-2, rtol=3e-2), "mismatch (B=16, dim=512, bf16)"

    print("KERNEL_OK")
</pallas_src>

<mosaic_0001>
module attributes {stable_mosaic.version = 11 : i64} {
  func.func @_thought_kernel_concat(%arg0: i32, %arg1: i32, %arg2: memref<2x64xf32, #tpu.memory_space<vmem>>, %arg3: memref<32x64xf32, #tpu.memory_space<vmem>>, %arg4: memref<1x32xf32, #tpu.memory_space<vmem>>, %arg5: memref<2x32xf32, #tpu.memory_space<vmem>>) attributes {dimension_semantics = [#tpu.dimension_semantics<parallel>, #tpu.dimension_semantics<parallel>], iteration_bounds = array<i64: 1, 1>, scalar_prefetch = 0 : i64, scratch_operands = 0 : i64, tpu.core_type = #tpu.core_type<tc>, window_params = [{transform_indices = @transform_0, window_bounds = array<i64: 2, 64>}, {transform_indices = @transform_1, window_bounds = array<i64: 32, 64>}, {transform_indices = @transform_2, window_bounds = array<i64: 1, 32>}, {transform_indices = @transform_3, window_bounds = array<i64: 2, 32>}]} {
    %c0 = arith.constant 0 : index
    %c0_0 = arith.constant 0 : index
    %0 = vector.load %arg2[%c0, %c0_0] : memref<2x64xf32, #tpu.memory_space<vmem>>, vector<2x64xf32>
    %c0_1 = arith.constant 0 : index
    %c0_2 = arith.constant 0 : index
    %1 = vector.load %arg3[%c0_1, %c0_2] : memref<32x64xf32, #tpu.memory_space<vmem>>, vector<32x64xf32>
    %cst = arith.constant dense<0.000000e+00> : vector<2x32xf32>
    %2 = tpu.matmul %0, %1, %cst {dimension_numbers = #tpu.dot_dimension_numbers<[1], [1], [0], [0], [0, 0, 1, 0], [], []>} : vector<2x64xf32>, vector<32x64xf32>, vector<2x32xf32> -> vector<2x32xf32>
    %c0_3 = arith.constant 0 : index
    %c0_4 = arith.constant 0 : index
    %3 = vector.load %arg4[%c0_3, %c0_4] : memref<1x32xf32, #tpu.memory_space<vmem>>, vector<1x32xf32>
    %4 = vector.broadcast %3 : vector<1x32xf32> to vector<2x32xf32>
    %5 = arith.addf %2, %4 : vector<2x32xf32>
    %c0_5 = arith.constant 0 : index
    %c0_6 = arith.constant 0 : index
    %6 = vector.load %arg5[%c0_5, %c0_6] : memref<2x32xf32, #tpu.memory_space<vmem>>, vector<2x32xf32>
    tpu.vector_store %arg5[%c0_5, %c0_6], %5 {strides = array<i32>} : memref<2x32xf32, #tpu.memory_space<vmem>>, vector<2x32xf32>,
    return
  }
  func.func @transform_0(%arg0: i32, %arg1: i32) -> (i32, i32) {
    %c0_i32 = arith.constant 0 : i32
    %c0_i32_0 = arith.constant 0 : i32
    return %arg0, %c0_i32 : i32, i32
  }
  func.func @transform_1(%arg0: i32, %arg1: i32) -> (i32, i32) {
    %c0_i32 = arith.constant 0 : i32
    %c0_i32_0 = arith.constant 0 : i32
    return %arg1, %c0_i32 : i32, i32
  }
  func.func @transform_2(%arg0: i32, %arg1: i32) -> (i32, i32) {
    %c0_i32 = arith.constant 0 : i32
    %c0_i32_0 = arith.constant 0 : i32
    return %c0_i32, %arg1 : i32, i32
  }
  func.func @transform_3(%arg0: i32, %arg1: i32) -> (i32, i32) {
    %c0_i32 = arith.constant 0 : i32
    return %arg0, %arg1 : i32, i32
  }
}

</mosaic_0001>

<bundles_post_ra>
// kernel: tpu_custom_call.1
= control target key start
LH: loop header
LB: loop body
LE: loop exit
PB: predicated region body
PF: predicated region fallthrough
CT: control target
= control target key end

     0   :  { %8 = vsyncpa [#allocation3], 0  ;;  %s341_s0 = inlined_call_operand.hbm [shape: f32[2,64], index: 0, kind: input, shape index: {}]   ;;  %s342_s1 = inlined_call_operand.hbm [shape: f32[32,64], index: 1, kind: input, shape index: {}]   ;;  %s343_s2 = inlined_call_operand.vmem [shape: f32[1,32], index: 2, kind: input, shape index: {}]   ;;  %s344_s3 = inlined_call_operand.hbm [shape: f32[2,32], index: 3, kind: output, shape index: {}]  }
   0x1   :  { %9 = vsyncpa [#allocation6], 0 }
   0x2   :  { %10 = vsyncpa [#allocation4], 0  ;;  %s267_s12 = smov [#allocation2]   ;;  %s268_s14 = smov [#allocation5]  }
   0x3   :  { %s17_s13 = sshll.u32 %s267_s12, 4  ;;  %s26_s15 = sshll.u32 %s268_s14, 4  ;;  %s18_s13 = int_to_ptr.vmem [resolvable:$true] %s17_s13  ;;  %s295_s15 = int_to_ptr.vmem [resolvable:$true] %s26_s15 }
   0x4   :  { %s195_s18 = scalar_lea.hbm %s341_s0, 32 }
   0x5   :  { %p196_p0 = scmp.ne.s32.totalorder %s341_s0, %s195_s18  ;;  %p199_p1 = scmp.lt.u32.totalorder %s195_s18, %s341_s0 }
   0x7   :  { %p201_p2 = pnand %p199_p1, %p196_p0 }
   0x9   :  { %204 = shalt.err (!%p201_p2)
}
   0xa   :  { %s205_s23 = scalar_lea.vmem %s18_s13, 32  ;;  %p210_p4 = scmp.lt.s32.totalorder %s18_s13, %s18_s13 }
   0xb   :  { %p206_p3 = scmp.ne.s32.totalorder %s18_s13, %s205_s23  ;;  %p211_p5 = scmp.lt.s32.totalorder %s205_s23, %s205_s23 }
   0xd   :  { %p212_p6 = por %p211_p5, %p210_p4 }
   0xf   :  { %p213_p7 = pnand %p212_p6, %p206_p3 }
  0x11   :  { %216 = shalt.err (!%p213_p7)
}
  0x12   :  { %20 = dma.hbm_to_vmem [thread:$0]  %s341_s0, 32, %s18_s13, [#allocation3]  }
  0x13   :  { %s217_s28 = scalar_lea.hbm %s342_s1, 512 }
  0x14   :  { %p218_p8 = scmp.ne.s32.totalorder %s342_s1, %s217_s28  ;;  %p221_p9 = scmp.lt.u32.totalorder %s217_s28, %s342_s1 }
  0x16   :  { %p223_p10 = pnand %p221_p9, %p218_p8 }
  0x18   :  { %226 = shalt.err (!%p223_p10)
}
  0x19   :  { %s227_s6 = scalar_lea.vmem %s295_s15, 512  ;;  %p232_p12 = scmp.lt.s32.totalorder %s295_s15, %s295_s15 }
  0x1a   :  { %p228_p11 = scmp.ne.s32.totalorder %s295_s15, %s227_s6  ;;  %p233_p13 = scmp.lt.s32.totalorder %s227_s6, %s227_s6 }
  0x1c   :  { %p234_p0 = por %p233_p13, %p232_p12 }
  0x1e   :  { %p235_p1 = pnand %p234_p0, %p228_p11 }
  0x20   :  { %238 = shalt.err (!%p235_p1)
}
  0x21   :  { %s269_s0 = smov 128   ;;  %s270_s7 = smov 8  }
  0x22   :  { %32 = dma.hbm_to_vmem [thread:$0]  %s342_s1, 512, %s295_s15, [#allocation6], %s269_s0, %s269_s0, %s270_s7  }
  0x23   :  { %261 = dma.done.wait [#allocation3], 32  }
  0x24   :  { %262 = vsyncadd [#allocation3], 4294967264 }
  0x25   :  { %263 = dma.done.wait [#allocation6], 512  }
  0x26   :  { %264 = vsyncadd [#allocation6], 4294966784  ;;  %v271_v0 = vmov 0.0|0.0   ;;  %vm272_vm0 = vmmov 0   ;;  %v273_v1 = vmov 0.0   ;;  %vm53_vm1 = vcmask 523264  }
  0x27   :  { %179 = vmatprep.subr.bf16.mxu0 %v271_v0  ;;  %176 = vmatprep.mubr.msk.f32.mxu0 %vm272_vm0, %v273_v1  ;;  %v42_v2 = vld [vmem:[#allocation5] sm:$0xff]  ;;  %v43_v3 = vld [vmem:[#allocation5 + $0x8] sm:$0xff]  ;;  %vm181_vm2 = vmpackc.low %vm53_vm1, %vm53_vm1  ;;  %s274_s11 = smov [#allocation7]   ;;  %vm139_vm3 = vcmask 254976  }
  0x28   :  { %v180_v4 = vpack.c.bf16 %v43_v3, %v42_v2  ;;  %v44_v5 = vld [vmem:[#allocation5 + $0x10] sm:$0xff]  ;;  %v45_v6 = vld [vmem:[#allocation5 + $0x18] sm:$0xff]  ;;  %s147_s12 = sshll.u32 %s274_s11, 4  ;;  %s148_s12 = int_to_ptr.vmem [resolvable:$true] %s147_s12 }
  0x29   :  { %v184_v7 = vpack.c.bf16 %v45_v6, %v44_v5  ;;  %v41_v8 = vld [vmem:[#allocation2] sm:$0x3]  ;;  %s239_s13 = scalar_lea.vmem %s148_s12, 32  ;;  %p244_p3 = scmp.lt.s32.totalorder %s148_s12, %s148_s12 }
  0x2a   :  { %182 = vmatpush3.bf16.xpose.msk.msra.mxu0 %vm181_vm2, %v180_v4  ;;  %v157_v9 = vld [vmem:[%s343_s2] ss:$0 sm:$0xff]  ;;  %p240_p2 = scmp.ne.s32.totalorder %s148_s12, %s239_s13  ;;  %p245_p4 = scmp.lt.s32.totalorder %s239_s13, %s239_s13 }
  0x2b   :  { %183 = vmatprep.subr.bf16.mxu0 %v271_v0 }
  0x2c   :  { %p246_p5 = por %p245_p4, %p244_p3 }
  0x2e   :  { %p247_p6 = pnand %p246_p5, %p240_p2 }
  0x32   :  { %186 = vmatpush3.bf16.xpose.msk.msra.mxu0 %vm181_vm2, %v184_v7 }
  0x39   :  { %177 = vmatmul.mubr.msk.f32.vlgmr.msra.gmra.mrb[0].mxu0 %vm53_vm1, %v41_v8 }
 0x10c   :  { %v135_v10 = vpop.f32.mrb[0].mxu0 }
 0x10d   :  { %v136_v11 = vadd.f32 %v157_v9, %v135_v10  ;;  %v178_v12 = vpop.f32.mrb[1].mxu0 }
 0x10f   :  { %140 = vst.msk [vmem:[#allocation7] sm:$0x3] %vm139_vm3, %v136_v11 }
 0x110   :  { %250 = shalt.err (!%p247_p6)
}
 0x111   :  { %s251_s16 = scalar_lea.hbm %s344_s3, 32 }
 0x112   :  { %p252_p7 = scmp.ne.s32.totalorder %s344_s3, %s251_s16  ;;  %p255_p8 = scmp.lt.u32.totalorder %s251_s16, %s344_s3 }
 0x114   :  { %p257_p9 = pnand %p255_p8, %p252_p7 }
 0x116   :  { %260 = shalt.err (!%p257_p9)
}
 0x117   :  { %150 = dma.vmem_to_hbm [thread:$0]  %s148_s12, 32, %s344_s3, [#allocation4]  }
 0x118   :  { %265 = dma.done.wait [#allocation4], 32  }
 0x119   :  { %266 = vsyncadd [#allocation4], 4294967264 }
 0x11a   :  { %154 = vsyncpa [#allocation3], 1 }
 0x11b   :  { %155 = vsyncpa [#allocation6], 1 }
 0x11c   :  { %156 = vsyncpa [#allocation4], 1 }

</bundles_post_ra>
